<compile_context>
chip_gen: v5e
topology: v5e:2x2
jax: 0.10.0
libtpu: 0.0.40
codegen_flags: <defaults>
</compile_context>

<pallas_src>
import functools
import math

import jax
import jax.numpy as jnp
from jax.experimental import pallas as pl
from jax.experimental.pallas import tpu as pltpu


def _round_up(a, m):
    return (a + m - 1) // m * m


def _sublayer_kernel(*refs, p, eps, d_real, d_pad, drop_mode, n_cols):
    """Ref layout:
       drop_mode == "hw"  : (seed_smem, x, w_t, b, gamma, beta, out[, xn_scr])
       drop_mode == "mask": (mask,      x, w_t, b, gamma, beta, out[, xn_scr])
       drop_mode == "none": (           x, w_t, b, gamma, beta, out[, xn_scr])
    """
    refs = list(refs)
    xn_ref = refs.pop() if n_cols > 1 else None
    if drop_mode == "none":
        drop_ref = None
        x_ref, w_ref, b_ref, g_ref, be_ref, o_ref = refs
    else:
        drop_ref, x_ref, w_ref, b_ref, g_ref, be_ref, o_ref = refs

    def _norm_bf16():
        # LayerNorm over the real last dim.  x pad columns are zero, so the
        # mean over d_pad columns equals the mean over d_real columns.
        x = x_ref[...].astype(jnp.float32)                  # (TILE_M, D_pad)
        inv_d = jnp.float32(1.0 / d_real)
        mean = jnp.sum(x, axis=-1, keepdims=True) * inv_d
        diff = x - mean
        if d_real != d_pad:
            # Keep pad columns out of the (centered) variance.
            col = jax.lax.broadcasted_iota(jnp.int32, x.shape, 1)
            diff = jnp.where(col < d_real, diff, 0.0)
        var = jnp.sum(diff * diff, axis=-1, keepdims=True) * inv_d
        inv = jax.lax.rsqrt(var + jnp.float32(eps))
        # gamma/beta are zero-padded -> pad columns of xn are exactly 0 and
        # contribute nothing to the matmul.
        xn = diff * inv * g_ref[...] + be_ref[...]
        return xn.astype(jnp.bfloat16)

    if n_cols > 1:
        # Compute LayerNorm once per row tile, reuse across column tiles.
        @pl.when(pl.program_id(1) == 0)
        def _():
            xn_ref[...] = _norm_bf16()
        xn = xn_ref[...]
    else:
        xn = _norm_bf16()

    # Linear on the MXU: bf16 inputs, f32 accumulate.
    y = jnp.dot(xn, w_ref[...], preferred_element_type=jnp.float32) + b_ref[...]

    # Dropout (inverted, train-mode).
    if p > 0.0:
        scale = jnp.float32(1.0 / (1.0 - p))
        if drop_mode == "hw":
            tile_id = pl.program_id(0) * pl.num_programs(1) + pl.program_id(1)
            pltpu.prng_seed(drop_ref[0] + tile_id)
            bits = pltpu.bitcast(pltpu.prng_random_bits(y.shape), jnp.uint32)
            thr = jnp.uint32(int(math.ceil(p * 4294967296.0)))
            y = jnp.where(bits >= thr, y * scale, 0.0)     # P(keep) = 1 - p
        else:
            # Portable fallback: precomputed mask already carries 1/(1-p).
            y = y * drop_ref[...]

    o_ref[...] = y.astype(o_ref.dtype)


def sublayer_forward(x, w_t, b, gamma, beta, *, p=0.1, eps=1e-5, seed=0):
    """x: (batch, seq, size). Returns dropout(linear(layernorm(x)))."""
    B, S, D = x.shape
    M = B * S
    d_pad = _round_up(D, 128)                   # lane-dense last dim

    on_tpu = jax.default_backend() == "tpu"
    drop_mode = "none" if p <= 0.0 else ("hw" if on_tpu else "mask")
    use_hw = drop_mode == "hw"

    # ---- Generation-aware VMEM budget (v5e/v6e: 128 MiB, v7x: 64 MiB) ----
    cap = 64 * 1024 * 1024
    if on_tpu:
        try:
            cap = int(pltpu.get_tpu_info().vmem_capacity_bytes)
        except Exception:
            pass                                 # conservative (v7x-safe) default
    budget = int(cap * 0.70)                     # tiles + invariants + temporaries
    vmem_limit = int(cap * 0.85)                 # scoped-VMEM ceiling for Mosaic

    # tile_m: as large as fits the budget, floor 256 (128 on v5e) to keep the
    # MXU fed and amortize the ~0.35 us per-grid-step overhead.
    tile_m_cap = min(512, _round_up(M, 8))
    floor = 256
    try:
        kind = jax.devices()[0].device_kind.lower()
        if "v5 lite" in kind or "v5e" in kind or "v5lite" in kind:
            floor = 128
    except Exception:
        pass
    tile_m_floor = min(tile_m_cap, floor)

    def footprint(tm, tn, ncols):
        bf, f4 = 2, 4
        streamed = 2 * tm * d_pad * bf                     # x tile (bf16), 2 bufs
        streamed += 2 * tm * tn * f4                       # out tile (f32), 2 bufs
        if drop_mode == "mask":
            streamed += 2 * tm * tn * f4                   # mask tile, 2 bufs
        streamed += 2 * tn * f4                            # bias tile
        w_bytes = (1 if ncols == 1 else 2) * d_pad * tn * bf
        gb = 2 * d_pad * f4                                # gamma + beta (1 buf)
        scratch = tm * d_pad * bf if ncols > 1 else 0      # xn cache
        temps = 3 * tm * d_pad * f4 + 3 * tm * tn * f4     # x/diff/xn, y/bits/where
        return streamed + w_bytes + gb + scratch + temps

    def pick_tiles():
        # Prefer a fully resident weight; otherwise column-tile it.
        tn_cands = [d_pad] + [t for t in (2048, 1024, 512, 256, 128) if t < d_pad]
        for tn in tn_cands:
            ncols = pl.cdiv(d_pad, tn)
            tm = tile_m_cap
            while True:
                if footprint(tm, tn, ncols) <= budget:
                    return tm, tn, ncols
                if tm <= tile_m_floor:
                    break
                tm = max(tile_m_floor, _round_up(tm // 2, 8))
        tn = min(128, d_pad)
        return tile_m_floor, tn, pl.cdiv(d_pad, tn)

    tile_m, tile_n, n_cols = pick_tiles()
    grid = (pl.cdiv(M, tile_m), n_cols)          # no M padding: partial last block

    # ---- Operand prep: bf16 activations/weights, zero-pad only the feature dim ----
    x2 = x.reshape(M, D).astype(jnp.bfloat16)
    w_p = w_t.astype(jnp.bfloat16)
    b_p = b.astype(jnp.float32)
    g_p = gamma.astype(jnp.float32)
    be_p = beta.astype(jnp.float32)
    if d_pad != D:
        pad = d_pad - D
        x2 = jnp.pad(x2, ((0, 0), (0, pad)))
        w_p = jnp.pad(w_p, ((0, pad), (0, pad)))
        b_p = jnp.pad(b_p, (0, pad))
        g_p = jnp.pad(g_p, (0, pad))             # zero gamma/beta keep pad cols at 0
        be_p = jnp.pad(be_p, (0, pad))
    b_p = b_p.reshape(1, d_pad)
    g_p = g_p.reshape(1, d_pad)
    be_p = be_p.reshape(1, d_pad)

    kernel = functools.partial(_sublayer_kernel, p=float(p), eps=float(eps),
                               d_real=D, d_pad=d_pad, drop_mode=drop_mode,
                               n_cols=n_cols)
    out_shape = jax.ShapeDtypeStruct((M, d_pad), jnp.float32)
    scratch_shapes = ([pltpu.VMEM((tile_m, d_pad), jnp.bfloat16)]
                      if n_cols > 1 else [])

    def run(single_buffer_invariants):
        def adapt(fn):
            # PrefetchScalarGridSpec passes the seed ref to every index_map.
            return (lambda i, j, s: fn(i, j)) if use_hw else fn

        def inv_spec(shape, imap):
            if single_buffer_invariants:
                return pl.BlockSpec(shape, imap, pipeline_mode=pl.Buffered(1))
            return pl.BlockSpec(shape, imap)

        x_spec = pl.BlockSpec((tile_m, d_pad), adapt(lambda i, j: (i, 0)))
        if n_cols == 1:                          # whole W^T resident, single-buffered
            w_spec = inv_spec((d_pad, tile_n), adapt(lambda i, j: (0, 0)))
            b_spec = inv_spec((1, tile_n), adapt(lambda i, j: (0, 0)))
        else:                                    # column-tiled W^T, double-buffered
            w_spec = pl.BlockSpec((d_pad, tile_n), adapt(lambda i, j: (0, j)))
            b_spec = pl.BlockSpec((1, tile_n), adapt(lambda i, j: (0, j)))
        g_spec = inv_spec((1, d_pad), adapt(lambda i, j: (0, 0)))
        be_spec = inv_spec((1, d_pad), adapt(lambda i, j: (0, 0)))
        out_spec = pl.BlockSpec((tile_m, tile_n), adapt(lambda i, j: (i, j)))

        cparams = (pltpu.CompilerParams(
            dimension_semantics=("parallel", "arbitrary"),
            vmem_limit_bytes=vmem_limit) if on_tpu else None)

        if use_hw:
            seed_arr = jnp.array([seed], dtype=jnp.int32)
            grid_spec = pltpu.PrefetchScalarGridSpec(
                num_scalar_prefetch=1, grid=grid,
                in_specs=[x_spec, w_spec, b_spec, g_spec, be_spec],
                out_specs=out_spec, scratch_shapes=scratch_shapes)
            return pl.pallas_call(kernel, out_shape=out_shape,
                                  grid_spec=grid_spec,
                                  compiler_params=cparams,
                                  )(seed_arr, x2, w_p, b_p, g_p, be_p)

        in_specs = [x_spec, w_spec, b_spec, g_spec, be_spec]
        args = [x2, w_p, b_p, g_p, be_p]
        if drop_mode == "mask":
            key = jax.random.fold_in(jax.random.PRNGKey(0), seed)
            keep = jax.random.bernoulli(key, 1.0 - p, (M, d_pad))
            mask = jnp.where(keep, jnp.float32(1.0 / (1.0 - p)), jnp.float32(0.0))
            in_specs = [pl.BlockSpec((tile_m, tile_n), lambda i, j: (i, j))] + in_specs
            args = [mask] + args
        kw = {"compiler_params": cparams} if cparams is not None else {}
        return pl.pallas_call(kernel, out_shape=out_shape, grid=grid,
                              in_specs=in_specs, out_specs=out_spec,
                              scratch_shapes=scratch_shapes, **kw)(*args)

    if on_tpu:
        try:
            out = run(True)
        except Exception:
            # pipeline_mode=pl.Buffered(1) unsupported on this jax build ->
            # default double-buffered invariants (correct, slightly more VMEM).
            out = run(False)
    else:
        out = run(False)

    return out[:, :D].reshape(B, S, D)


if __name__ == "__main__":
    batch, seq, size = 2, 8, 32
    dropout_p = 0.1
    eps = 1e-5

    key = jax.random.PRNGKey(0)
    kx, kw, kb = jax.random.split(key, 3)

    x = jax.random.normal(kx, (batch, seq, size), dtype=jnp.float32)

    # nn.Linear(size, size) init: U(-1/sqrt(in), 1/sqrt(in)); store W^T directly.
    bound = 1.0 / math.sqrt(size)
    w_t = jax.random.uniform(kw, (size, size), dtype=jnp.float32,
                             minval=-bound, maxval=bound)
    b = jax.random.uniform(kb, (size,), dtype=jnp.float32,
                           minval=-bound, maxval=bound)

    # nn.LayerNorm(size) affine params (default init)
    gamma = jnp.ones((size,), dtype=jnp.float32)
    beta = jnp.zeros((size,), dtype=jnp.float32)

    out = sublayer_forward(x, w_t, b, gamma, beta, p=dropout_p, eps=eps, seed=42)
    out = jax.block_until_ready(out)

    assert out.shape == (batch, seq, size)
    assert bool(jnp.all(jnp.isfinite(out)))

    # Dropout-agnostic reference check: every output element must equal either
    # 0 (dropped) or ref/(1-p) (kept), with ref = linear(layernorm(x)) in f32.
    x2 = x.reshape(batch * seq, size)
    mu = jnp.mean(x2, axis=-1, keepdims=True)
    va = jnp.mean((x2 - mu) ** 2, axis=-1, keepdims=True)
    xn = (x2 - mu) / jnp.sqrt(va + eps) * gamma + beta
    ref = (xn @ w_t + b) / (1.0 - dropout_p)
    o2 = out.reshape(batch * seq, size)
    err = jnp.minimum(jnp.abs(o2 - ref), jnp.abs(o2))
    rel = err / (1.0 + jnp.abs(ref))
    assert float(jnp.max(rel)) < 0.1, float(jnp.max(rel))

    print("KERNEL_OK")
</pallas_src>

<mosaic_0001>
module attributes {stable_mosaic.version = 11 : i64} {
  func.func @_sublayer_kernel(%arg0: i32, %arg1: i32, %arg2: memref<16x128xf32, #tpu.memory_space<vmem>>, %arg3: memref<16x128xbf16, #tpu.memory_space<vmem>>, %arg4: memref<128x128xbf16, #tpu.memory_space<vmem>>, %arg5: memref<1x128xf32, #tpu.memory_space<vmem>>, %arg6: memref<1x128xf32, #tpu.memory_space<vmem>>, %arg7: memref<1x128xf32, #tpu.memory_space<vmem>>, %arg8: memref<16x128xf32, #tpu.memory_space<vmem>>) attributes {dimension_semantics = [#tpu.dimension_semantics<arbitrary>, #tpu.dimension_semantics<arbitrary>], iteration_bounds = array<i64: 1, 1>, scalar_prefetch = 0 : i64, scratch_operands = 0 : i64, tpu.core_type = #tpu.core_type<tc>, window_params = [{transform_indices = @transform_0, window_bounds = array<i64: 16, 128>}, {transform_indices = @transform_1, window_bounds = array<i64: 16, 128>}, {pipeline_mode = #tpu.pipeline_mode<synchronous>, transform_indices = @transform_2, window_bounds = array<i64: 128, 128>}, {pipeline_mode = #tpu.pipeline_mode<synchronous>, transform_indices = @transform_3, window_bounds = array<i64: 1, 128>}, {pipeline_mode = #tpu.pipeline_mode<synchronous>, transform_indices = @transform_4, window_bounds = array<i64: 1, 128>}, {pipeline_mode = #tpu.pipeline_mode<synchronous>, transform_indices = @transform_5, window_bounds = array<i64: 1, 128>}, {transform_indices = @transform_6, window_bounds = array<i64: 16, 128>}]} {
    %c0 = arith.constant 0 : index
    %c0_0 = arith.constant 0 : index
    %0 = vector.load %arg3[%c0, %c0_0] : memref<16x128xbf16, #tpu.memory_space<vmem>>, vector<16x128xbf16>
    %1 = arith.extf %0 : vector<16x128xbf16> to vector<16x128xf32>
    %cst = arith.constant dense<0.000000e+00> : vector<16xf32>
    %2 = vector.multi_reduction <add>, %1, %cst [1] : vector<16x128xf32> to vector<16xf32>
    %3 = vector.shape_cast %2 : vector<16xf32> to vector<16x1xf32>
    %cst_1 = arith.constant 3.125000e-02 : f32
    %4 = vector.broadcast %cst_1 : f32 to vector<16x1xf32>
    %5 = arith.mulf %3, %4 : vector<16x1xf32>
    %6 = vector.broadcast %5 : vector<16x1xf32> to vector<16x128xf32>
    %7 = arith.subf %1, %6 : vector<16x128xf32>
    %8 = tpu.iota {dimensions = array<i32: 1>} : vector<16x128xi32>
    %c32_i32 = arith.constant 32 : i32
    %9 = vector.broadcast %c32_i32 : i32 to vector<16x128xi32>
    %10 = arith.cmpi slt, %8, %9 : vector<16x128xi32>
    %cst_2 = arith.constant 0.000000e+00 : f32
    %11 = vector.broadcast %cst_2 : f32 to vector<16x128xf32>
    %12 = arith.select %10, %7, %11 : vector<16x128xi1>, vector<16x128xf32>
    %13 = arith.mulf %12, %12 : vector<16x128xf32>
    %cst_3 = arith.constant dense<0.000000e+00> : vector<16xf32>
    %14 = vector.multi_reduction <add>, %13, %cst_3 [1] : vector<16x128xf32> to vector<16xf32>
    %15 = vector.shape_cast %14 : vector<16xf32> to vector<16x1xf32>
    %cst_4 = arith.constant 3.125000e-02 : f32
    %16 = vector.broadcast %cst_4 : f32 to vector<16x1xf32>
    %17 = arith.mulf %15, %16 : vector<16x1xf32>
    %cst_5 = arith.constant 9.99999974E-6 : f32
    %18 = vector.broadcast %cst_5 : f32 to vector<16x1xf32>
    %19 = arith.addf %17, %18 : vector<16x1xf32>
    %20 = math.rsqrt %19 : vector<16x1xf32>
    %21 = vector.broadcast %20 : vector<16x1xf32> to vector<16x128xf32>
    %22 = arith.mulf %12, %21 : vector<16x128xf32>
    %c0_6 = arith.constant 0 : index
    %c0_7 = arith.constant 0 : index
    %23 = vector.load %arg6[%c0_6, %c0_7] : memref<1x128xf32, #tpu.memory_space<vmem>>, vector<1x128xf32>
    %24 = vector.broadcast %23 : vector<1x128xf32> to vector<16x128xf32>
    %25 = arith.mulf %22, %24 : vector<16x128xf32>
    %c0_8 = arith.constant 0 : index
    %c0_9 = arith.constant 0 : index
    %26 = vector.load %arg7[%c0_8, %c0_9] : memref<1x128xf32, #tpu.memory_space<vmem>>, vector<1x128xf32>
    %27 = vector.broadcast %26 : vector<1x128xf32> to vector<16x128xf32>
    %28 = arith.addf %25, %27 : vector<16x128xf32>
    %29 = arith.truncf %28 : vector<16x128xf32> to vector<16x128xbf16>
    %c0_10 = arith.constant 0 : index
    %c0_11 = arith.constant 0 : index
    %30 = vector.load %arg4[%c0_10, %c0_11] : memref<128x128xbf16, #tpu.memory_space<vmem>>, vector<128x128xbf16>
    %cst_12 = arith.constant dense<0.000000e+00> : vector<16x128xf32>
    %31 = tpu.matmul %29, %30, %cst_12 {dimension_numbers = #tpu.dot_dimension_numbers<[1], [0], [0], [1], [0, 0, 1, 1], [], []>} : vector<16x128xbf16>, vector<128x128xbf16>, vector<16x128xf32> -> vector<16x128xf32>
    %c0_13 = arith.constant 0 : index
    %c0_14 = arith.constant 0 : index
    %32 = vector.load %arg5[%c0_13, %c0_14] : memref<1x128xf32, #tpu.memory_space<vmem>>, vector<1x128xf32>
    %33 = vector.broadcast %32 : vector<1x128xf32> to vector<16x128xf32>
    %34 = arith.addf %31, %33 : vector<16x128xf32>
    %c0_15 = arith.constant 0 : index
    %c0_16 = arith.constant 0 : index
    %35 = vector.load %arg2[%c0_15, %c0_16] : memref<16x128xf32, #tpu.memory_space<vmem>>, vector<16x128xf32>
    %36 = arith.mulf %34, %35 : vector<16x128xf32>
    %c0_17 = arith.constant 0 : index
    %c0_18 = arith.constant 0 : index
    %37 = vector.load %arg8[%c0_17, %c0_18] : memref<16x128xf32, #tpu.memory_space<vmem>>, vector<16x128xf32>
    tpu.vector_store %arg8[%c0_17, %c0_18], %36 {strides = array<i32>} : memref<16x128xf32, #tpu.memory_space<vmem>>, vector<16x128xf32>,
    return
  }
  func.func @transform_0(%arg0: i32, %arg1: i32) -> (i32, i32) {
    %c0_i32 = arith.constant 0 : i32
    return %arg0, %arg1 : i32, i32
  }
  func.func @transform_1(%arg0: i32, %arg1: i32) -> (i32, i32) {
    %c0_i32 = arith.constant 0 : i32
    %c0_i32_0 = arith.constant 0 : i32
    return %arg0, %c0_i32 : i32, i32
  }
  func.func @transform_2(%arg0: i32, %arg1: i32) -> (i32, i32) {
    %c0_i32 = arith.constant 0 : i32
    %c0_i32_0 = arith.constant 0 : i32
    %c0_i32_1 = arith.constant 0 : i32
    return %c0_i32, %c0_i32_0 : i32, i32
  }
  func.func @transform_3(%arg0: i32, %arg1: i32) -> (i32, i32) {
    %c0_i32 = arith.constant 0 : i32
    %c0_i32_0 = arith.constant 0 : i32
    %c0_i32_1 = arith.constant 0 : i32
    return %c0_i32, %c0_i32_0 : i32, i32
  }
  func.func @transform_4(%arg0: i32, %arg1: i32) -> (i32, i32) {
    %c0_i32 = arith.constant 0 : i32
    %c0_i32_0 = arith.constant 0 : i32
    %c0_i32_1 = arith.constant 0 : i32
    return %c0_i32, %c0_i32_0 : i32, i32
  }
  func.func @transform_5(%arg0: i32, %arg1: i32) -> (i32, i32) {
    %c0_i32 = arith.constant 0 : i32
    %c0_i32_0 = arith.constant 0 : i32
    %c0_i32_1 = arith.constant 0 : i32
    return %c0_i32, %c0_i32_0 : i32, i32
  }
  func.func @transform_6(%arg0: i32, %arg1: i32) -> (i32, i32) {
    %c0_i32 = arith.constant 0 : i32
    return %arg0, %arg1 : i32, i32
  }
}

</mosaic_0001>

<bundles_post_ra>
// kernel: tpu_custom_call.1
= control target key start
LH: loop header
LB: loop body
LE: loop exit
PB: predicated region body
PF: predicated region fallthrough
CT: control target
= control target key end

     0   :  { %11 = vsyncpa [#allocation3], 0  ;;  %s472_s0 = inlined_call_operand.hbm [shape: f32[16,128], index: 0, kind: input, shape index: {}]   ;;  %s473_s1 = inlined_call_operand.hbm [shape: bf16[16,128], index: 1, kind: input, shape index: {}]   ;;  %s474_s2 = inlined_call_operand.hbm [shape: bf16[128,128], index: 2, kind: input, shape index: {}]   ;;  %s475_s3 = inlined_call_operand.vmem [shape: f32[1,128], index: 3, kind: input, shape index: {}]   ;;  %s476_s4 = inlined_call_operand.vmem [shape: f32[1,128], index: 4, kind: input, shape index: {}]   ;;  %s477_s5 = inlined_call_operand.vmem [shape: f32[1,128], index: 5, kind: input, shape index: {}]   ;;  %s478_s6 = inlined_call_operand.hbm [shape: f32[16,128], index: 6, kind: output, shape index: {}]  }
   0x1   :  { %12 = vsyncpa [#allocation6], 0  ;;  %s31_s23 = sshll.u32 %s473_s1, 4  ;;  %s32_s23 = int_to_ptr.hbm [resolvable:$true] %s31_s23 }
   0x2   :  { %13 = vsyncpa [#allocation4], 0  ;;  %s402_s24 = smov [#allocation5]   ;;  %s18_s28 = sshll.u32 %s472_s0, 4  ;;  %s19_s28 = int_to_ptr.hbm [resolvable:$true] %s18_s28 }
   0x3   :  { %s33_s25 = sshll.u32 %s402_s24, 4  ;;  %s403_s29 = smov 64   ;;  %s34_s25 = int_to_ptr.vmem [resolvable:$true] %s33_s25 }
   0x4   :  { %s404_s30 = smov 4   ;;  %s405_s7 = smov [#allocation2]  }
   0x5   :  { %39 = dma.hbm_to_vmem [thread:$0]  %s32_s23, 128, %s34_s25, [#allocation6], %s403_s29, %s403_s29, %s404_s30  }
   0x6   :  { %s20_s8 = sshll.u32 %s405_s7, 4  ;;  %s406_s9 = smov 128   ;;  %s21_s8 = int_to_ptr.vmem [resolvable:$true] %s20_s8 }
   0x7   :  { %s407_s10 = smov 8   ;;  %s44_s12 = sshll.u32 %s474_s2, 4  ;;  %s45_s12 = int_to_ptr.hbm [resolvable:$true] %s44_s12 }
   0x8   :  { %26 = dma.hbm_to_vmem [thread:$0]  %s19_s28, 256, %s21_s8, [#allocation3], %s406_s9, %s406_s9, %s407_s10  }
   0x9   :  { %s408_s13 = smov [#allocation7]  }
   0xa   :  { %s46_s0 = sshll.u32 %s408_s13, 4  ;;  %s47_s0 = int_to_ptr.vmem [resolvable:$true] %s46_s0 }
   0xb   :  { %52 = dma.hbm_to_vmem [thread:$0]  %s45_s12, 1024, %s47_s0, [#allocation6], %s403_s29, %s403_s29, %s404_s30  }
   0xc   :  { %396 = dma.done.wait [#allocation3], 256  }
   0xd   :  { %397 = vsyncadd [#allocation3], 4294967040 }
   0xe   :  { %398 = dma.done.wait [#allocation6], 1152  }
   0xf   :  { %399 = vsyncadd [#allocation6], 4294966144  ;;  %v282_v0 = vld [vmem:[#allocation5] sm:$0xff]   ;;  %v83_v3 = vlaneseq  ;;  %v279_v16 = vld [vmem:[#allocation7 + $0x30] sm:$0xff]  ;;  %s227_s21 = sshll.u32 %s478_s6, 4  ;;  %s228_s21 = int_to_ptr.hbm [resolvable:$true] %s227_s21 }
  0x10   :  { %v283_v1 = vunpack.c.l.bf16 %v282_v0  ;;  %v284_v2 = vunpack.c.h.bf16 %v282_v0  ;;  %v280_v15 = vld [vmem:[#allocation7 + $0x38] sm:$0xff]  ;;  %v278_v17 = vld [vmem:[#allocation7 + $0x28] sm:$0xff]  ;;  %v277_v18 = vld [vmem:[#allocation7 + $0x20] sm:$0xff] }
  0x11   :  { %v84_v4 = vand.u32 127, %v83_v3  ;;  %201 = vmatpush.bf16.msra.mxu0 %v280_v15  ;;  %v276_v19 = vld [vmem:[#allocation7 + $0x18] sm:$0xff]  ;;  %v275_v20 = vld [vmem:[#allocation7 + $0x10] sm:$0xff]  ;;  %v274_v21 = vld [vmem:[#allocation7 + $0x8] sm:$0xff] }
  0x12   :  { %75 = vadd.xlane.f32.xlu0 %v283_v1  ;;  %v273_v23 = vld [vmem:[#allocation7] sm:$0xff]  ;;  %v293_v42 = vld [vmem:[%s476_s4] ss:$0 sm:$0xff]  ;;  %v216_v58 = vld [vmem:[#allocation2 + $0x8] sm:$0xff]  ;;  %s409_s4 = smov [#allocation8]  }
  0x13   :  { %vm85_vm0 = vcmp.lt.s32.totalorder %v84_v4, 32  ;;  %v294_v47 = vld [vmem:[%s477_s5] ss:$0 sm:$0xff]  ;;  %s225_s19 = sshll.u32 %s409_s4, 4  ;;  %s226_s19 = int_to_ptr.vmem [resolvable:$true] %s225_s19 }
  0x14   :  { %v295_v52 = vld [vmem:[%s475_s3] ss:$0 sm:$0xff] }
  0x15   :  { %202 = vmatpush.bf16.msra.mxu0 %v279_v16  ;;  %v215_v54 = vld [vmem:[#allocation2] sm:$0xff] }
  0x19   :  { %203 = vmatpush.bf16.msra.mxu0 %v278_v17 }
  0x1a   :  { %77 = vadd.xlane.f32.xlu0 %v284_v2 }
  0x1d   :  { %204 = vmatpush.bf16.msra.mxu0 %v277_v18 }
  0x21   :  { %205 = vmatpush.bf16.msra.mxu0 %v276_v19 }
  0x25   :  { %206 = vmatpush.bf16.msra.mxu0 %v275_v20 }
  0x29   :  { %207 = vmatpush.bf16.msra.mxu0 %v274_v21 }
  0x2d   :  { %208 = vmatpush.bf16.msra.mxu0 %v273_v23 }
  0x85   :  { %v76_v5 = vpop.xlane.xlu0 %75 }
  0x86   :  { %v79_v6 = vmul.f32 0.03125, %v76_v5 }
  0x88   :  { %v81_v7 = vsub.f32 %v283_v1, %v79_v6 }
  0x8a   :  { %v86_v8 = vsel %vm85_vm0, %v81_v7, 0.0 }
  0x8b   :  { %v88_v9 = vmul.f32 %v86_v8, %v86_v8 }
  0x8d   :  { %90 = vadd.xlane.f32.xlu1 %v88_v9  ;;  %v78_v10 = vpop.xlane.xlu0 %77 }
  0x8e   :  { %v80_v11 = vmul.f32 0.03125, %v78_v10 }
  0x90   :  { %v82_v12 = vsub.f32 %v284_v2, %v80_v11 }
  0x92   :  { %v87_v13 = vsel %vm85_vm0, %v82_v12, 0.0 }
  0x93   :  { %v89_v14 = vmul.f32 %v87_v13, %v87_v13 }
  0x95   :  { %92 = vadd.xlane.f32.xlu1 %v89_v14 }
 0x100   :  { %v91_v22 = vpop.xlane.xlu1 %90 }
 0x101   :  { %v94_v24 = vmul.f32 0.03125, %v91_v22 }
 0x103   :  { %v96_v25 = vadd.f32 1e-05, %v94_v24 }
 0x105   :  { %296 = vrsqrt.f32 %v96_v25  ;;  %vm104_vm2 = vweird.f32 %v96_v25 }
 0x108   :  { %v93_v26 = vpop.xlane.xlu1 %92 }
 0x109   :  { %v95_v27 = vmul.f32 0.03125, %v93_v26 }
 0x10b   :  { %v297_v28 = vpop.eup %296  ;;  %v97_v29 = vadd.f32 1e-05, %v95_v27 }
 0x10c   :  { %v99_v30 = vmul.f32 %v297_v28, %v96_v25  ;;  %vm105_vm1 = vweird.f32 %v297_v28 }
 0x10d   :  { %298 = vrsqrt.f32 %v97_v29  ;;  %vm106_vm3 = vmor %vm104_vm2, %vm105_vm1  ;;  %vm114_vm5 = vweird.f32 %v97_v29 }
 0x10e   :  { %v100_v31 = vmul.f32 %v297_v28, %v99_v30 }
 0x110   :  { %v101_v32 = vmul.f32 0.5, %v100_v31 }
 0x112   :  { %v102_v33 = vsub.f32 1.5, %v101_v32 }
 0x113   :  { %v299_v34 = vpop.eup %298 }
 0x114   :  { %v103_v35 = vmul.f32 %v297_v28, %v102_v33  ;;  %v109_v36 = vmul.f32 %v299_v34, %v97_v29  ;;  %vm115_vm4 = vweird.f32 %v299_v34 }
 0x115   :  { %vm116_vm6 = vmor %vm114_vm5, %vm115_vm4 }
 0x116   :  { %v110_v37 = vmul.f32 %v299_v34, %v109_v36  ;;  %v107_v39 = vsel %vm106_vm3, %v297_v28, %v103_v35 }
 0x117   :  { %v118_v41 = vmul.f32 %v107_v39, %v86_v8 }
 0x118   :  { %v111_v38 = vmul.f32 0.5, %v110_v37 }
 0x119   :  { %v124_v46 = vmul.f32 %v293_v42, %v118_v41 }
 0x11a   :  { %v112_v40 = vsub.f32 1.5, %v111_v38 }
 0x11b   :  { %v130_v49 = vadd.f32 %v294_v47, %v124_v46 }
 0x11c   :  { %v113_v43 = vmul.f32 %v299_v34, %v112_v40 }
 0x11e   :  { %v117_v44 = vsel %vm116_vm6, %v299_v34, %v113_v43 }
 0x11f   :  { %v119_v45 = vmul.f32 %v117_v44, %v87_v13 }
 0x121   :  { %v125_v48 = vmul.f32 %v293_v42, %v119_v45 }
 0x123   :  { %v131_v50 = vadd.f32 %v294_v47, %v125_v48 }
 0x125   :  { %v132_v51 = vpack.c.bf16 %v131_v50, %v130_v49 }
 0x127   :  { %209 = vmatmul.bf16.vlgmr.msra.gmra.mxu0 %v132_v51 }
 0x1a4   :  { %v210_v53 = vpop.f32.mrf.mxu0 }
 0x1a5   :  { %v211_v55 = vadd.f32 %v295_v52, %v210_v53 }
 0x1a7   :  { %v217_v56 = vmul.f32 %v215_v54, %v211_v55 }
 0x1a9   :  { %219 = vst [vmem:[#allocation8] sm:$0xff] %v217_v56 }
 0x1ac   :  { %v212_v57 = vpop.f32.mrf.mxu0 }
 0x1ad   :  { %v213_v59 = vadd.f32 %v295_v52, %v212_v57 }
 0x1af   :  { %v218_v60 = vmul.f32 %v216_v58, %v213_v59 }
 0x1b1   :  { %220 = vst [vmem:[#allocation8 + $0x8] sm:$0xff] %v218_v60 }
 0x1b2   :  { %233 = dma.vmem_to_hbm [thread:$0]  %s226_s19, 256, %s228_s21, [#allocation4], %s406_s9, %s406_s9, %s407_s10  }
 0x1b3   :  { %400 = dma.done.wait [#allocation4], 256  }
 0x1b4   :  { %401 = vsyncadd [#allocation4], 4294967040 }
 0x1b5   :  { %238 = vsyncpa [#allocation3], 1 }
 0x1b6   :  { %239 = vsyncpa [#allocation6], 1 }
 0x1b7   :  { %240 = vsyncpa [#allocation4], 1 }

</bundles_post_ra>
